<compile_context>
chip_gen: v7x
topology: tpu7x:2x2x1
jax: 0.10.0
libtpu: 0.0.40
codegen_flags: <defaults>
</compile_context>

<pallas_src>
import jax
import jax.numpy as jnp
from jax.experimental import pallas as pl
from jax.experimental.pallas import tpu as pltpu

SPATIAL_OPERATIONS = ("none", "skip_connect", "gcn")


def num_mixed_ops(num_search_node: int) -> int:
    # matches SpatialSearchLayer.get_num_mixed_ops
    return sum(range(1, num_search_node))


def _spatial_operator_kernel(x_ref, k_ref, o_ref):
    """One lane-dense GEMM per tile: [tm, NC] @ [NC, tn], f32 accumulation on the MXU."""
    o_ref[...] = jnp.dot(x_ref[...], k_ref[...],
                         preferred_element_type=jnp.float32).astype(o_ref.dtype)


def _masked_softmax(arch_params, mask):
    logits = jnp.where(mask[None, :] > 0, arch_params.astype(jnp.float32), -jnp.inf)
    return jax.nn.softmax(logits, axis=-1)


def _build_composite_operator(adj, gcn_weights, alpha, num_search_node):
    """Collapse the (linear) spatial DAG into one [N*C, N*C] right-multiply matrix.

    Per mixed op (acting on X of shape [N, C]):
        MixedOp_i(X) = alpha[i,1] * X + alpha[i,2] * (A @ X @ W_i)
    As a right-multiply on vec_row(X) (index n*C + c):
        K_i = alpha[i,1] * I + alpha[i,2] * kron(A.T, W_i)
    DAG (same wiring as the PyTorch forward):
        node_0 = I ;  node_t = sum_{j<t} node_j @ K_op  (op increments j-fastest)
        K_total = sum_t node_t
    """
    n = adj.shape[0]
    c = gcn_weights.shape[-1]
    nc = n * c
    eye = jnp.eye(nc, dtype=jnp.float32)
    adj_t = adj.astype(jnp.float32).T

    def op_mat(i):
        kr = jnp.kron(adj_t, gcn_weights[i].astype(jnp.float32))
        return alpha[i, 1] * eye + alpha[i, 2] * kr

    node_ops = [eye]
    total = eye
    op = 0
    for t in range(1, num_search_node):
        cur = None
        for j in range(t):
            term = node_ops[j] @ op_mat(op)
            cur = term if cur is None else cur + term
            op += 1
        total = total + cur
        node_ops.append(cur)
    return total


def spatial_search_layer(x_nchw, adj, gcn_weights, arch_params, mask,
                         num_search_node, *, block_m=2048, compute_dtype=None,
                         vmem_limit_bytes=48 * 1024 * 1024):
    """x_nchw: [B, C, N, T], adj: [N, N], gcn_weights: [n_mixed, C, C],
    arch_params: [n_mixed, n_ops] (spatial_dag[dag_i]), mask: [n_ops]."""
    B, C, N, T = x_nchw.shape
    n_mixed = num_mixed_ops(num_search_node)
    assert gcn_weights.shape == (n_mixed, C, C)
    assert arch_params.shape[0] == n_mixed
    if n_mixed == 0:
        return x_nchw
    M = B * T
    nc = N * C

    # Tiny glue in XLA: masked softmax + operator composition (a few 512x512 matmuls).
    alpha = _masked_softmax(arch_params, mask)
    k_total = _build_composite_operator(adj, gcn_weights, alpha, num_search_node)

    cdt = jnp.dtype(compute_dtype) if compute_dtype is not None else x_nchw.dtype
    # NCHW -> [M, N*C] (lane-dense minor dim = 512); the optional bf16 cast fuses with the
    # transpose in XLA so the layout glue costs one HBM pass.
    x_flat = jnp.transpose(x_nchw, (0, 3, 2, 1)).reshape(M, nc).astype(cdt)
    k_flat = k_total.astype(cdt)

    # Tile M (second-minor dim, multiple of 8).  Keep >= 2 grid steps whenever M allows it
    # so both v7x TensorCores get work; larger tiles amortize the fixed per-step cost.
    if M <= 8:
        tm = M
    else:
        tm = max(8, (min(block_m, M) // 8) * 8)
        if tm >= M:
            tm = max(8, ((M // 2) // 8) * 8)
    grid_m = pl.cdiv(M, tm)

    # Output columns of the operator: resident in one block at this size (512);
    # tile only if the operator is very wide.
    if nc <= 2048:
        tn = nc
    else:
        tn = 512
        assert nc % tn == 0, "pad N*C to a multiple of 512 for wide composite operators"
    grid_n = nc // tn

    out_flat = pl.pallas_call(
        _spatial_operator_kernel,
        out_shape=jax.ShapeDtypeStruct((M, nc), cdt),
        grid=(grid_m, grid_n),
        in_specs=[
            pl.BlockSpec((tm, nc), lambda i, j: (i, 0)),   # x tile (pipelined over M)
            pl.BlockSpec((nc, tn), lambda i, j: (0, j)),   # composite operator (resident)
        ],
        out_specs=pl.BlockSpec((tm, tn), lambda i, j: (i, j)),
        compiler_params=pltpu.CompilerParams(
            dimension_semantics=("parallel", "parallel"),
            vmem_limit_bytes=vmem_limit_bytes,
        ),
    )(x_flat, k_flat)

    # [M, N*C] -> NCHW (fused with the cast back to the input dtype).
    return jnp.transpose(out_flat.reshape(B, T, N, C), (0, 3, 2, 1)).astype(x_nchw.dtype)


def reference_forward(x, adj, gcn_w, arch_params, mask, num_search_node):
    """Pure-JAX reference mirroring the PyTorch forward (NCHW layout)."""
    logits = jnp.where(mask[None, :] > 0, arch_params, -jnp.inf)
    alpha = jax.nn.softmax(logits, axis=-1)

    def mixed_op(inp, i):
        s = jnp.einsum("nm,bcmt->bcnt", adj, inp)
        g = jnp.einsum("bcnt,co->bont", s, gcn_w[i])
        return alpha[i, 1] * inp + alpha[i, 2] * g

    n_mixed = num_mixed_ops(num_search_node)
    node_idx = 0
    current = 0.0
    node_outputs = [x]
    for i in range(n_mixed):
        current = current + mixed_op(node_outputs[node_idx], i)
        if node_idx + 1 >= len(node_outputs):
            node_outputs.append(current)
            current = 0.0
            node_idx = 0
        else:
            node_idx += 1
    if node_idx != 0:
        node_outputs.append(current)
    ret = 0.0
    for o in node_outputs:
        ret = ret + o
    return ret


if __name__ == "__main__":
    # config-equivalent constants
    num_search_node = 3                      # config.num_temporal_search_node
    scale_list = [1, 2]                      # config.scale_list (len = #DAGs)
    n_ops = len(SPATIAL_OPERATIONS)          # len(config.spatial_operations)
    n_mixed = num_mixed_ops(num_search_node)

    B, C, N, T = 2, 32, 16, 8
    key = jax.random.PRNGKey(0)
    kx, ka, kw = jax.random.split(key, 3)

    x = jax.random.normal(kx, (B, C, N, T), dtype=jnp.float32)
    adj = jax.random.uniform(ka, (N, N), dtype=jnp.float32)
    adj = adj / jnp.sum(adj, axis=-1, keepdims=True)            # row-normalized adj_mx
    gcn_w = 0.1 * jax.random.normal(kw, (n_mixed, C, C), dtype=jnp.float32)

    # spatial_dag: torch init is zeros -> uniform softmax over unmasked ops
    spatial_dag = [jnp.zeros((n_mixed, n_ops), jnp.float32) for _ in scale_list]
    dag_i = 0
    mask = jnp.ones((n_ops,), dtype=jnp.float32)

    ref = reference_forward(x, adj, gcn_w, spatial_dag[dag_i], mask, num_search_node)

    # f32 path (tm is auto-halved to 8 here so the parallel grid has 2 steps).
    out = spatial_search_layer(x, adj, gcn_w, spatial_dag[dag_i], mask, num_search_node)
    out = jax.block_until_ready(out)
    assert out.shape == x.shape, (out.shape, x.shape)
    assert jnp.allclose(out, ref, atol=1e-3, rtol=1e-3), \
        float(jnp.max(jnp.abs(out - ref)))

    # bf16 MXU-operand / IO path (operator composed in f32, f32 accumulation in the dot).
    out_bf16 = spatial_search_layer(x, adj, gcn_w, spatial_dag[dag_i], mask,
                                    num_search_node, compute_dtype=jnp.bfloat16)
    out_bf16 = jax.block_until_ready(out_bf16)
    assert out_bf16.shape == x.shape, (out_bf16.shape, x.shape)
    assert jnp.allclose(out_bf16, ref, atol=1e-1, rtol=1e-1), \
        float(jnp.max(jnp.abs(out_bf16 - ref)))

    print("KERNEL_OK")
</pallas_src>

<mosaic_0001>
module attributes {stable_mosaic.version = 11 : i64} {
  func.func @_spatial_operator_kernel(%arg0: i32, %arg1: i32, %arg2: memref<8x512xf32, #tpu.memory_space<vmem>>, %arg3: memref<512x512xf32, #tpu.memory_space<vmem>>, %arg4: memref<8x512xf32, #tpu.memory_space<vmem>>) attributes {dimension_semantics = [#tpu.dimension_semantics<parallel>, #tpu.dimension_semantics<parallel>], iteration_bounds = array<i64: 2, 1>, scalar_prefetch = 0 : i64, scratch_operands = 0 : i64, tpu.core_type = #tpu.core_type<tc>, window_params = [{transform_indices = @transform_0, window_bounds = array<i64: 8, 512>}, {transform_indices = @transform_1, window_bounds = array<i64: 512, 512>}, {transform_indices = @transform_2, window_bounds = array<i64: 8, 512>}]} {
    %c0 = arith.constant 0 : index
    %c0_0 = arith.constant 0 : index
    %0 = vector.load %arg2[%c0, %c0_0] : memref<8x512xf32, #tpu.memory_space<vmem>>, vector<8x512xf32>
    %c0_1 = arith.constant 0 : index
    %c0_2 = arith.constant 0 : index
    %1 = vector.load %arg3[%c0_1, %c0_2] : memref<512x512xf32, #tpu.memory_space<vmem>>, vector<512x512xf32>
    %cst = arith.constant dense<0.000000e+00> : vector<8x512xf32>
    %2 = tpu.matmul %0, %1, %cst {dimension_numbers = #tpu.dot_dimension_numbers<[1], [0], [0], [1], [0, 0, 1, 1], [], []>} : vector<8x512xf32>, vector<512x512xf32>, vector<8x512xf32> -> vector<8x512xf32>
    %c0_3 = arith.constant 0 : index
    %c0_4 = arith.constant 0 : index
    %3 = vector.load %arg4[%c0_3, %c0_4] : memref<8x512xf32, #tpu.memory_space<vmem>>, vector<8x512xf32>
    tpu.vector_store %arg4[%c0_3, %c0_4], %2 {strides = array<i32>} : memref<8x512xf32, #tpu.memory_space<vmem>>, vector<8x512xf32>,
    return
  }
  func.func @transform_0(%arg0: i32, %arg1: i32) -> (i32, i32) {
    %c0_i32 = arith.constant 0 : i32
    %c0_i32_0 = arith.constant 0 : i32
    return %arg0, %c0_i32 : i32, i32
  }
  func.func @transform_1(%arg0: i32, %arg1: i32) -> (i32, i32) {
    %c0_i32 = arith.constant 0 : i32
    %c0_i32_0 = arith.constant 0 : i32
    return %c0_i32, %arg1 : i32, i32
  }
  func.func @transform_2(%arg0: i32, %arg1: i32) -> (i32, i32) {
    %c0_i32 = arith.constant 0 : i32
    return %arg0, %arg1 : i32, i32
  }
}

</mosaic_0001>

<bundles_post_ra>
// kernel: tpu_custom_call.1
= control target key start
LH: loop header
LB: loop body
LE: loop exit
PB: predicated region body
PF: predicated region fallthrough
CT: control target
= control target key end

     0   :  { %7 = vsyncpa [#allocation3], 0  ;;  %s1601_s0 = inlined_call_operand.hbm [shape: f32[16,512], index: 0, kind: input, shape index: {}]   ;;  %s1602_s1 = inlined_call_operand.hbm [shape: f32[512,512], index: 1, kind: input, shape index: {}]   ;;  %s1603_s2 = inlined_call_operand.hbm [shape: f32[16,512], index: 2, kind: output, shape index: {}]  }
   0x1   :  { %9 = vsyncpa [#allocation3 + $0x1], 0 }
   0x2   :  { %10 = vsyncpa [#allocation6], 0 }
   0x3   :  { %11 = vsyncpa [#allocation4], 0 }
   0x4   :  { %13 = vsyncpa [#allocation4 + $0x1], 0  ;;  %s1377_s9 = smov 0   ;;  %s1379_s10 = smov 0  }
   0x5   :  { %s1381_s11 = smov 0   ;;  %s1383_s12 = smov 0  }
   0x6   :  { %s1385_s13 = smov 0   ;;  %s1387_s14 = smov 0  }
   0x7 LB: > { %s857_s15 = sadd.s32 4294967295, %s1355_s14   ;;  %s858_s16 = sadd.s32 4294967294, %s1355_s14   ;;  %s1355_s14 = sphi %s1387_s14, %s19_s14   ;;  %s1351_s13 = sphi %s1385_s13, %s1627_s13   ;;  %s1347_s12 = sphi %s1383_s12, %s1626_s12   ;;  %s1343_s11 = sphi %s1381_s11, %s1625_s11   ;;  %s1339_s10 = sphi %s1379_s10, %s1624_s10   ;;  %s1335_s9 = sphi %s1377_s9, %s1623_s9  }
   0x8   : > { %p51_p0 = scmp.ne.s32.totalorder %s1339_s10, %s1335_s9  ;;  %p1411_p1 = scmp.eq.s32.totalorder %s857_s15, 0 }
   0x9   : > { %p1415_p2 = scmp.eq.s32.totalorder %s857_s15, 1  ;;  %p109_p3 = scmp.eq.s32.totalorder %s858_s16, 1 }
   0xa   : > { %s1608_s17 = scalar_select %p1411_p1, 1, 0 }
   0xb   : > { %s1609_s18 = scalar_select %p1415_p2, 1, 0 }
   0xc   : > { %p1421_p4 = por %p1411_p1, %p51_p0  ;;  %p859_p5 = scmp.ge.s32.totalorder %s1355_s14, 1 }
   0xd   : > { %p1426_p6 = por %p109_p3, %p51_p0  ;;  %p116_p7 = scmp.lt.s32.totalorder %s1355_s14, 3 }
   0xe   : > { %s1610_s19 = scalar_select %p1421_p4, 1, 0 }
   0xf   : > { %s1611_s20 = scalar_select %p1426_p6, 1, 0 }
  0x10   : > { %p1431_p8 = pnand %p859_p5, %p116_p7  ;;  %s1357_s22 = smov [#allocation5]  }
  0x11   : > { %s131_s23 = sshll.u32 %s1357_s22, 4  ;;  %s31_s25 = sadd.s32 1, %s1351_s13  ;;  %s132_s23 = int_to_ptr.vmem [resolvable:$true] %s131_s23 }
  0x12   : > { %s1612_s21 = scalar_select %p1431_p8, 1, 0 }
  0x13   : > { %p1144_p9 = pneg %p1431_p8  ;;  %s1211_s28 = scalar_lea.hbm %s1602_s1, 32768 }
  0x14   : > { %p1212_p12 = scmp.ne.s32.totalorder %s1602_s1, %s1211_s28  ;;  %p1218_p5 = scmp.lt.u32.totalorder %s1211_s28, %s1602_s1 }
  0x15   : > { %p1440_p11 = pnand %p1144_p9, %p1411_p1 }
  0x17   : > { %p1213_p13 = pneg %p1440_p11 }
  0x19   : > { %p1214_p0 = pnand %p1213_p13, %p1212_p12 }
  0x1b   : > { %p1215_p3 = pneg %p1214_p0 }
  0x1d   : > { %p1220_p7 = pnand %p1218_p5, %p1215_p3 }
  0x1f   : > { %1223 = shalt.err (!%p1220_p7)
}
  0x20   : > { %s1224_s5 = scalar_lea.vmem %s132_s23, 32768  ;;  %p1232_p1 = scmp.lt.s32.totalorder %s132_s23, %s132_s23 }
  0x21   : > { %p1225_p9 = scmp.ne.s32.totalorder %s132_s23, %s1224_s5  ;;  %p1233_p4 = scmp.lt.s32.totalorder %s1224_s5, %s1224_s5 }
  0x23   : > { %p1227_p10 = pnand %p1225_p9, %p1213_p13  ;;  %p1234_p8 = por %p1233_p4, %p1232_p1 }
  0x25   : > { %p1228_p6 = pneg %p1227_p10 }
  0x27   : > { %p1235_p2 = pnand %p1234_p8, %p1228_p6 }
  0x29   : > { %1238 = shalt.err (!%p1235_p2)
}
  0x2a   : > { %s1358_s6 = smov 512   ;;  %s1359_s7 = smov 32  }
  0x2b   : > { %1147 = dma.hbm_to_vmem [thread:$0]  (!%p1440_p11), %s1602_s1, 32768, %s132_s23, [#allocation6], %s1358_s6, %s1358_s6, %s1359_s7  }
  0x2c   : > { %p33_p1 = scmp.ge.s32.totalorder %s31_s25, 2  ;;  %s38_s16 = sadd.s32 1, %s1343_s11 }
  0x2d   : > { %p45_p2 = scmp.ne.s32.totalorder %s1343_s11, %s1339_s10  ;;  %p46_p4 = scmp.eq.s32.totalorder %s1355_s14, 0 }
  0x2e   : > { %s1629_s25 = smov (%p33_p1, %s31_s25), 0  ;;  %p1615_p8 = scmp.ne.s32.totalorder %s1609_s18, 0 }
  0x2f   : > { %p1467_p6 = por %p46_p4, %p45_p2  ;;  %s35_s24 = ssub.s32 %s1351_s13, %s1629_s25 }
  0x30   : > { %p1473_p10 = por %p1615_p8, %p45_p2  ;;  %p1157_p12 = scmp.lt.s32.totalorder %s1355_s14, 2 }
  0x31   : > { %p36_p11 = scmp.eq.s32.totalorder %s35_s24, 0  ;;  %s145_s23 = sand.u32 1, %s1343_s11  }
  0x32   : > { %s862_s27 = sshll.u32 %s145_s23, 5  ;;  %s874_s29 = sshll.u32 %s1351_s13, 9 }
  0x33   : > { %s1482_s28 = scalar_select %p36_p11, %s1343_s11, %s38_s16  }
  0x34   : > { %s1488_s4 = scalar_lea.hbm %s1601_s0, %s874_s29  ;;  %s149_s18 = scalar_lea.vmem [#allocation2], %s862_s27 }
  0x35   : > { %s157_s5 = sshll.u32 %s149_s18, 4  ;;  %p1494_p13 = pnand %p1157_p12, %p1467_p6  ;;  %s1490_s5 = int_to_ptr.vmem [resolvable:$true] %s157_s5 }
  0x36   : > { %s146_s7 = scalar_lea.sflag [#allocation3], %s145_s23  ;;  %s1239_s8 = scalar_lea.hbm %s1488_s4, 512 }
  0x37   : > { %p1240_p0 = scmp.ne.s32.totalorder %s1488_s4, %s1239_s8  ;;  %p1241_p3 = pneg %p1494_p13 }
  0x38   : > { %s1244_s24 = scalar_lea.hbm %s1601_s0, 1024  ;;  %p1245_p9 = scmp.lt.u32.totalorder %s1488_s4, %s1601_s0 }
  0x39   : > { %p1242_p5 = pnand %p1241_p3, %p1240_p0  ;;  %p1246_p1 = scmp.lt.u32.totalorder %s1244_s24, %s1239_s8 }
  0x3a   : > { %p1248_p4 = scmp.lt.u32.totalorder %s1239_s8, %s1488_s4 }
  0x3b   : > { %p1243_p7 = pneg %p1242_p5  ;;  %p1247_p2 = por %p1246_p1, %p1245_p9 }
  0x3d   : > { %p1249_p6 = por %p1248_p4, %p1247_p2 }
  0x3f   : > { %p1250_p8 = pnand %p1249_p6, %p1243_p7 }
  0x41   : > { %1253 = shalt.err (!%p1250_p8)
}
  0x42   : > { %s1254_s23 = scalar_lea.vmem %s1490_s5, 512  ;;  %s1360_s29 = smov [#allocation2]  }
  0x43   : > { %p1255_p12 = scmp.ne.s32.totalorder %s1490_s5, %s1254_s23  ;;  %s1259_s30 = sshll.u32 %s1360_s29, 4  ;;  %s1260_s30 = int_to_ptr.vmem [resolvable:$false] %s1259_s30 }
  0x44   : > { %s1261_s3 = scalar_lea.vmem %s1260_s30, 1024  ;;  %p1262_p5 = scmp.lt.s32.totalorder %s1490_s5, %s1260_s30 }
  0x45   : > { %p1257_p11 = pnand %p1255_p12, %p1241_p3  ;;  %p1263_p9 = scmp.lt.s32.totalorder %s1261_s3, %s1254_s23 }
  0x47   : > { %p1258_p0 = pneg %p1257_p11  ;;  %p1264_p1 = por %p1263_p9, %p1262_p5 }
  0x49   : > { %p1265_p2 = pnand %p1264_p1, %p1258_p0 }
  0x4b   : > { %1268 = shalt.err (!%p1265_p2)
}
  0x4c   : > { %1151 = dma.hbm_to_vmem [thread:$0]  (!%p1494_p13), %s1488_s4, 512, %s1490_s5, %s146_s7  }
  0x4d   : > { %p1618_p7 = scmp.ne.s32.totalorder %s1612_s21, 0 }
  0x4e   : > { %s1526_s18 = sand.u32 (!%p1618_p7), 1, %s1339_s10   ;;  %p1619_p3 = scmp.ne.s32.totalorder (!%p1618_p7), %s1610_s19, 0 }
  0x4f   : > { %166 = sbr.rel (%p1618_p7) target bundleno = 450 (0x1c2), region = 28  ;;  %s866_s8 = sshll.u32 (!%p1618_p7), %s1526_s18, 5 }
  0x50   : > { %s169_s15 = scalar_lea.sflag (!%p1618_p7), [#allocation3], %s1526_s18  ;;  %s1532_s16 = scalar_lea.vmem (!%p1618_p7), [#allocation2], %s866_s8 }
  0x56   : > { %1322 = dma.done.wait (%p1619_p3), %s169_s15, 512  }
  0x57   : > { %1324 = vsyncadd (%p1619_p3), %s169_s15, 4294966784  ;;  %p1620_p13 = scmp.ne.s32.totalorder %s1608_s17, 0 }
  0x59   : > { %1326 = dma.done.wait (%p1620_p13), [#allocation6], 32768  }
  0x5a   : > { %1328 = vsyncadd (%p1620_p13), [#allocation6], 4294934528  ;;  %v204_v0 = vld [vmem:[#allocation5 + $0x8] sm:$0xff]  ;;  %v206_v2 = vld [vmem:[#allocation5 + $0x18] sm:$0xff]  ;;  %s196_s17 = scalar_lea.vmem [#allocation7], %s866_s8  ;;  %s875_s21 = sshll.u32 %s1347_s12, 9 }
  0x5b   : > { %v208_v1 = vld [vmem:[#allocation5 + $0x28] sm:$0xff]  ;;  %v210_v4 = vld [vmem:[#allocation5 + $0x38] sm:$0xff]  ;;  %v203_v5 = vld [vmem:[#allocation5] sm:$0xff]  ;;  %s764_s19 = sshll.u32 %s196_s17, 4  ;;  %s1554_s6 = scalar_lea.hbm %s1603_s2, %s875_s21  ;;  %s1549_s19 = int_to_ptr.vmem [resolvable:$true] %s764_s19 }
  0x5c   : > { %v876_v3 = vpack.c.bf16 %v208_v1, %v204_v0  ;;  %v207_v6 = vld [vmem:[#allocation5 + $0x20] sm:$0xff]  ;;  %v1004_v7 = vpack.c.bf16 %v210_v4, %v206_v2  ;;  %v205_v9 = vld [vmem:[#allocation5 + $0x10] sm:$0xff]  ;;  %v212_v11 = vld [vmem:[#allocation5 + $0x48] sm:$0xff]  ;;  %s748_s7 = scalar_lea.sflag [#allocation4], %s1526_s18  ;;  %s1269_s12 = scalar_lea.vmem %s1549_s19, 512 }
  0x5d   : > { %v878_v8 = vpack.c.bf16 %v207_v6, %v203_v5  ;;  %v209_v10 = vld [vmem:[#allocation5 + $0x30] sm:$0xff]  ;;  %v216_v13 = vld [vmem:[#allocation5 + $0x68] sm:$0xff]  ;;  %v214_v14 = vld [vmem:[#allocation5 + $0x58] sm:$0xff]  ;;  %p1270_p4 = scmp.ne.s32.totalorder %s1549_s19, %s1269_s12  ;;  %s1361_s24 = smov [#allocation7]  }
  0x5e   : > { %877 = vmatprep.subr.bf16.mxu0 %v876_v3  ;;  %v1006_v12 = vpack.c.bf16 %v209_v10, %v205_v9  ;;  %v218_v15 = vld [vmem:[#allocation5 + $0x78] sm:$0xff]  ;;  %1005 = vmatprep.subr.bf16.mxu1 %v1004_v7  ;;  %v880_v16 = vpack.c.bf16 %v216_v13, %v212_v11  ;;  %v211_v18 = vld [vmem:[#allocation5 + $0x40] sm:$0xff]  ;;  %v213_v20 = vld [vmem:[#allocation5 + $0x50] sm:$0xff]  ;;  %s1273_s22 = sshll.u32 %s1361_s24, 4  ;;  %s1274_s22 = int_to_ptr.vmem [resolvable:$false] %s1273_s22 }
  0x5f   : > { %879 = vmatpush1.bf16.msra.mxu0 %v878_v8  ;;  %v1008_v17 = vpack.c.bf16 %v218_v15, %v214_v14  ;;  %v215_v19 = vld [vmem:[#allocation5 + $0x60] sm:$0xff]  ;;  %v217_v22 = vld [vmem:[#allocation5 + $0x70] sm:$0xff]  ;;  %v220_v23 = vld [vmem:[#allocation5 + $0x88] sm:$0xff]  ;;  %p1271_p6 = pnand %p1270_p4, %p1473_p10  ;;  %s1275_s27 = scalar_lea.vmem %s1274_s22, 1024 }
  0x60   : > { %1007 = vmatpush1.bf16.msra.mxu1 %v1006_v12  ;;  %v882_v21 = vpack.c.bf16 %v215_v19, %v211_v18  ;;  %v224_v24 = vld [vmem:[#allocation5 + $0xa8] sm:$0xff]  ;;  %881 = vmatprep.subr.bf16.mxu0 %v880_v16  ;;  %v1010_v25 = vpack.c.bf16 %v217_v22, %v213_v20  ;;  %v222_v27 = vld [vmem:[#allocation5 + $0x98] sm:$0xff]  ;;  %v219_v29 = vld [vmem:[#allocation5 + $0x80] sm:$0xff]  ;;  %p1276_p12 = scmp.lt.s32.totalorder %s1549_s19, %s1274_s22  ;;  %p1277_p11 = scmp.lt.s32.totalorder %s1275_s27, %s1269_s12 }
  0x61   : > { %1009 = vmatprep.subr.bf16.mxu1 %v1008_v17  ;;  %v884_v26 = vpack.c.bf16 %v224_v24, %v220_v23  ;;  %v226_v28 = vld [vmem:[#allocation5 + $0xb8] sm:$0xff]  ;;  %v223_v31 = vld [vmem:[#allocation5 + $0xa0] sm:$0xff]  ;;  %v221_v32 = vld [vmem:[#allocation5 + $0x90] sm:$0xff]  ;;  %p1272_p8 = pneg %p1271_p6 }
  0x62   : > { %v1012_v30 = vpack.c.bf16 %v226_v28, %v222_v27  ;;  %v225_v33 = vld [vmem:[#allocation5 + $0xb0] sm:$0xff]  ;;  %v886_v34 = vpack.c.bf16 %v223_v31, %v219_v29  ;;  %v228_v35 = vld [vmem:[#allocation5 + $0xc8] sm:$0xff]  ;;  %v230_v37 = vld [vmem:[#allocation5 + $0xd8] sm:$0xff]  ;;  %p1278_p0 = por %p1277_p11, %p1276_p12 }
  0x63   : > { %883 = vmatpush1.bf16.msra.mxu0 %v882_v21  ;;  %v232_v36 = vld [vmem:[#allocation5 + $0xe8] sm:$0xff]  ;;  %v1014_v38 = vpack.c.bf16 %v225_v33, %v221_v32  ;;  %v234_v40 = vld [vmem:[#allocation5 + $0xf8] sm:$0xff]  ;;  %v227_v41 = vld [vmem:[#allocation5 + $0xc0] sm:$0xff] }
  0x64   : > { %1011 = vmatpush1.bf16.msra.mxu1 %v1010_v25  ;;  %885 = vmatprep.subr.bf16.mxu0 %v884_v26  ;;  %v888_v39 = vpack.c.bf16 %v232_v36, %v228_v35  ;;  %v231_v42 = vld [vmem:[#allocation5 + $0xe0] sm:$0xff]  ;;  %v1016_v43 = vpack.c.bf16 %v234_v40, %v230_v37  ;;  %v229_v44 = vld [vmem:[#allocation5 + $0xd0] sm:$0xff]  ;;  %v236_v46 = vld [vmem:[#allocation5 + $0x108] sm:$0xff]  ;;  %p1279_p5 = pnand %p1278_p0, %p1272_p8 }
  0x65   : > { %1013 = vmatprep.subr.bf16.mxu1 %v1012_v30  ;;  %v233_v45 = vld [vmem:[#allocation5 + $0xf0] sm:$0xff]  ;;  %v240_v47 = vld [vmem:[#allocation5 + $0x128] sm:$0xff]  ;;  %v238_v48 = vld [vmem:[#allocation5 + $0x118] sm:$0xff]  ;;  %v890_v50 = vpack.c.bf16 %v231_v42, %v227_v41 }
  0x66   : > { %v242_v49 = vld [vmem:[#allocation5 + $0x138] sm:$0xff]  ;;  %v1018_v51 = vpack.c.bf16 %v233_v45, %v229_v44  ;;  %v892_v52 = vpack.c.bf16 %v240_v47, %v236_v46  ;;  %v235_v53 = vld [vmem:[#allocation5 + $0x100] sm:$0xff]  ;;  %v237_v55 = vld [vmem:[#allocation5 + $0x110] sm:$0xff] }
  0x67   : > { %887 = vmatpush1.bf16.msra.mxu0 %v886_v34  ;;  %v239_v54 = vld [vmem:[#allocation5 + $0x120] sm:$0xff]  ;;  %v1020_v56 = vpack.c.bf16 %v242_v49, %v238_v48  ;;  %v241_v57 = vld [vmem:[#allocation5 + $0x130] sm:$0xff]  ;;  %v244_v58 = vld [vmem:[#allocation5 + $0x148] sm:$0xff] }
  0x68   : > { %1015 = vmatpush1.bf16.msra.mxu1 %v1014_v38  ;;  %889 = vmatprep.subr.bf16.mxu0 %v888_v39  ;;  %v248_v59 = vld [vmem:[#allocation5 + $0x168] sm:$0xff]  ;;  %v246_v60 = vld [vmem:[#allocation5 + $0x158] sm:$0xff]  ;;  %v894_v62 = vpack.c.bf16 %v239_v54, %v235_v53  ;;  %v1022_v63 = vpack.c.bf16 %v241_v57, %v237_v55  ;;  %v243_v1 = vld [vmem:[#allocation5 + $0x140] sm:$0xff] }
  0x69   : > { %1017 = vmatprep.subr.bf16.mxu1 %v1016_v43  ;;  %v250_v61 = vld [vmem:[#allocation5 + $0x178] sm:$0xff]  ;;  %v896_v0 = vpack.c.bf16 %v248_v59, %v244_v58  ;;  %v247_v2 = vld [vmem:[#allocation5 + $0x160] sm:$0xff]  ;;  %v245_v3 = vld [vmem:[#allocation5 + $0x150] sm:$0xff] }
  0x6a   : > { %v1024_v4 = vpack.c.bf16 %v250_v61, %v246_v60  ;;  %v249_v5 = vld [vmem:[#allocation5 + $0x170] sm:$0xff]  ;;  %v252_v6 = vld [vmem:[#allocation5 + $0x188] sm:$0xff]  ;;  %v254_v8 = vld [vmem:[#allocation5 + $0x198] sm:$0xff]  ;;  %v898_v10 = vpack.c.bf16 %v247_v2, %v243_v1 }
  0x6b   : > { %891 = vmatpush1.bf16.msra.mxu0 %v890_v50  ;;  %v256_v7 = vld [vmem:[#allocation5 + $0x1a8] sm:$0xff]  ;;  %v258_v9 = vld [vmem:[#allocation5 + $0x1b8] sm:$0xff]  ;;  %v1026_v11 = vpack.c.bf16 %v249_v5, %v245_v3  ;;  %v251_v13 = vld [vmem:[#allocation5 + $0x180] sm:$0xff] }
  0x6c   : > { %1019 = vmatpush1.bf16.msra.mxu1 %v1018_v51  ;;  %893 = vmatprep.subr.bf16.mxu0 %v892_v52  ;;  %v900_v12 = vpack.c.bf16 %v256_v7, %v252_v6  ;;  %v255_v14 = vld [vmem:[#allocation5 + $0x1a0] sm:$0xff]  ;;  %v253_v15 = vld [vmem:[#allocation5 + $0x190] sm:$0xff]  ;;  %v1028_v16 = vpack.c.bf16 %v258_v9, %v254_v8  ;;  %v260_v18 = vld [vmem:[#allocation5 + $0x1c8] sm:$0xff] }
  0x6d   : > { %1021 = vmatprep.subr.bf16.mxu1 %v1020_v56  ;;  %v257_v17 = vld [vmem:[#allocation5 + $0x1b0] sm:$0xff]  ;;  %v264_v19 = vld [vmem:[#allocation5 + $0x1e8] sm:$0xff]  ;;  %v262_v20 = vld [vmem:[#allocation5 + $0x1d8] sm:$0xff]  ;;  %v902_v22 = vpack.c.bf16 %v255_v14, %v251_v13 }
  0x6e   : > { %v266_v21 = vld [vmem:[#allocation5 + $0x1f8] sm:$0xff]  ;;  %v1030_v23 = vpack.c.bf16 %v257_v17, %v253_v15  ;;  %v904_v24 = vpack.c.bf16 %v264_v19, %v260_v18  ;;  %v259_v25 = vld [vmem:[#allocation5 + $0x1c0] sm:$0xff]  ;;  %v261_v27 = vld [vmem:[#allocation5 + $0x1d0] sm:$0xff] }
  0x6f   : > { %895 = vmatpush1.bf16.msra.mxu0 %v894_v62  ;;  %v263_v26 = vld [vmem:[#allocation5 + $0x1e0] sm:$0xff]  ;;  %v1032_v28 = vpack.c.bf16 %v266_v21, %v262_v20  ;;  %v265_v29 = vld [vmem:[#allocation5 + $0x1f0] sm:$0xff]  ;;  %v268_v30 = vld [vmem:[#allocation5 + $0x208] sm:$0xff] }
  0x70   : > { %1023 = vmatpush1.bf16.msra.mxu1 %v1022_v63  ;;  %897 = vmatprep.subr.bf16.mxu0 %v896_v0  ;;  %v272_v31 = vld [vmem:[#allocation5 + $0x228] sm:$0xff]  ;;  %v270_v32 = vld [vmem:[#allocation5 + $0x218] sm:$0xff]  ;;  %v906_v34 = vpack.c.bf16 %v263_v26, %v259_v25  ;;  %v1034_v35 = vpack.c.bf16 %v265_v29, %v261_v27  ;;  %v267_v37 = vld [vmem:[#allocation5 + $0x200] sm:$0xff] }
  0x71   : > { %1025 = vmatprep.subr.bf16.mxu1 %v1024_v4  ;;  %v274_v33 = vld [vmem:[#allocation5 + $0x238] sm:$0xff]  ;;  %v908_v36 = vpack.c.bf16 %v272_v31, %v268_v30  ;;  %v271_v38 = vld [vmem:[#allocation5 + $0x220] sm:$0xff]  ;;  %v269_v39 = vld [vmem:[#allocation5 + $0x210] sm:$0xff] }
  0x72   : > { %v1036_v40 = vpack.c.bf16 %v274_v33, %v270_v32  ;;  %v273_v41 = vld [vmem:[#allocation5 + $0x230] sm:$0xff]  ;;  %v276_v42 = vld [vmem:[#allocation5 + $0x248] sm:$0xff]  ;;  %v278_v44 = vld [vmem:[#allocation5 + $0x258] sm:$0xff]  ;;  %v910_v46 = vpack.c.bf16 %v271_v38, %v267_v37 }
  0x73   : > { %899 = vmatpush1.bf16.msra.mxu0 %v898_v10  ;;  %v280_v43 = vld [vmem:[#allocation5 + $0x268] sm:$0xff]  ;;  %v282_v45 = vld [vmem:[#allocation5 + $0x278] sm:$0xff]  ;;  %v1038_v47 = vpack.c.bf16 %v273_v41, %v269_v39  ;;  %v275_v49 = vld [vmem:[#allocation5 + $0x240] sm:$0xff] }
  0x74   : > { %1027 = vmatpush1.bf16.msra.mxu1 %v1026_v11  ;;  %901 = vmatprep.subr.bf16.mxu0 %v900_v12  ;;  %v912_v48 = vpack.c.bf16 %v280_v43, %v276_v42  ;;  %v279_v50 = vld [vmem:[#allocation5 + $0x260] sm:$0xff]  ;;  %v277_v51 = vld [vmem:[#allocation5 + $0x250] sm:$0xff]  ;;  %v1040_v52 = vpack.c.bf16 %v282_v45, %v278_v44  ;;  %v284_v54 = vld [vmem:[#allocation5 + $0x288] sm:$0xff] }
  0x75   : > { %1029 = vmatprep.subr.bf16.mxu1 %v1028_v16  ;;  %v281_v53 = vld [vmem:[#allocation5 + $0x270] sm:$0xff]  ;;  %v288_v55 = vld [vmem:[#allocation5 + $0x2a8] sm:$0xff]  ;;  %v286_v56 = vld [vmem:[#allocation5 + $0x298] sm:$0xff]  ;;  %v914_v58 = vpack.c.bf16 %v279_v50, %v275_v49 }
  0x76   : > { %v290_v57 = vld [vmem:[#allocation5 + $0x2b8] sm:$0xff]  ;;  %v1042_v59 = vpack.c.bf16 %v281_v53, %v277_v51  ;;  %v916_v60 = vpack.c.bf16 %v288_v55, %v284_v54  ;;  %v283_v61 = vld [vmem:[#allocation5 + $0x280] sm:$0xff]  ;;  %v285_v63 = vld [vmem:[#allocation5 + $0x290] sm:$0xff] }
  0x77   : > { %903 = vmatpush1.bf16.msra.mxu0 %v902_v22  ;;  %v287_v62 = vld [vmem:[#allocation5 + $0x2a0] sm:$0xff]  ;;  %v1044_v0 = vpack.c.bf16 %v290_v57, %v286_v56  ;;  %v289_v1 = vld [vmem:[#allocation5 + $0x2b0] sm:$0xff]  ;;  %v292_v2 = vld [vmem:[#allocation5 + $0x2c8] sm:$0xff] }
  0x78   : > { %1031 = vmatpush1.bf16.msra.mxu1 %v1030_v23  ;;  %905 = vmatprep.subr.bf16.mxu0 %v904_v24  ;;  %v296_v3 = vld [vmem:[#allocation5 + $0x2e8] sm:$0xff]  ;;  %v294_v4 = vld [vmem:[#allocation5 + $0x2d8] sm:$0xff]  ;;  %v918_v6 = vpack.c.bf16 %v287_v62, %v283_v61  ;;  %v291_v7 = vld [vmem:[#allocation5 + $0x2c0] sm:$0xff]  ;;  %v1046_v8 = vpack.c.bf16 %v289_v1, %v285_v63 }
  0x79   : > { %1033 = vmatprep.subr.bf16.mxu1 %v1032_v28  ;;  %v298_v5 = vld [vmem:[#allocation5 + $0x2f8] sm:$0xff]  ;;  %v920_v9 = vpack.c.bf16 %v296_v3, %v292_v2  ;;  %v295_v10 = vld [vmem:[#allocation5 + $0x2e0] sm:$0xff]  ;;  %v293_v11 = vld [vmem:[#allocation5 + $0x2d0] sm:$0xff] }
  0x7a   : > { %v297_v12 = vld [vmem:[#allocation5 + $0x2f0] sm:$0xff]  ;;  %v1048_v13 = vpack.c.bf16 %v298_v5, %v294_v4  ;;  %v300_v14 = vld [vmem:[#allocation5 + $0x308] sm:$0xff]  ;;  %v302_v17 = vld [vmem:[#allocation5 + $0x318] sm:$0xff]  ;;  %v922_v19 = vpack.c.bf16 %v295_v10, %v291_v7 }
  0x7b   : > { %907 = vmatpush1.bf16.msra.mxu0 %v906_v34  ;;  %v304_v15 = vld [vmem:[#allocation5 + $0x328] sm:$0xff]  ;;  %v306_v18 = vld [vmem:[#allocation5 + $0x338] sm:$0xff]  ;;  %v1050_v20 = vpack.c.bf16 %v297_v12, %v293_v11  ;;  %v299_v22 = vld [vmem:[#allocation5 + $0x300] sm:$0xff] }
  0x7c   : > { %1035 = vmatpush1.bf16.msra.mxu1 %v1034_v35  ;;  %909 = vmatprep.subr.bf16.mxu0 %v908_v36  ;;  %v200_v16 = vld [vmem:[%s1532_s16 + $0x8] sm:$0xff]  ;;  %v924_v21 = vpack.c.bf16 %v304_v15, %v300_v14  ;;  %v303_v23 = vld [vmem:[#allocation5 + $0x320] sm:$0xff]  ;;  %v301_v24 = vld [vmem:[#allocation5 + $0x310] sm:$0xff]  ;;  %v1052_v25 = vpack.c.bf16 %v306_v18, %v302_v17 }
  0x7d   : > { %1037 = vmatprep.subr.bf16.mxu1 %v1036_v40  ;;  %523 = vmatprep.mubr.f32.mxu0 %v200_v16  ;;  %v305_v26 = vld [vmem:[#allocation5 + $0x330] sm:$0xff]  ;;  %v308_v27 = vld [vmem:[#allocation5 + $0x348] sm:$0xff]  ;;  %v310_v29 = vld [vmem:[#allocation5 + $0x358] sm:$0xff]  ;;  %v926_v31 = vpack.c.bf16 %v303_v23, %v299_v22 }
  0x7e   : > { %665 = vmatprep.mubr.f32.mxu1 %v200_v16  ;;  %v312_v28 = vld [vmem:[#allocation5 + $0x368] sm:$0xff]  ;;  %v314_v30 = vld [vmem:[#allocation5 + $0x378] sm:$0xff]  ;;  %v1054_v32 = vpack.c.bf16 %v305_v26, %v301_v24  ;;  %v307_v34 = vld [vmem:[#allocation5 + $0x340] sm:$0xff] }
  0x7f   : > { %911 = vmatpush1.bf16.msra.mxu0 %v910_v46  ;;  %v928_v33 = vpack.c.bf16 %v312_v28, %v308_v27  ;;  %v311_v35 = vld [vmem:[#allocation5 + $0x360] sm:$0xff]  ;;  %v309_v36 = vld [vmem:[#allocation5 + $0x350] sm:$0xff]  ;;  %v1056_v37 = vpack.c.bf16 %v314_v30, %v310_v29  ;;  %v316_v39 = vld [vmem:[#allocation5 + $0x388] sm:$0xff] }
  0x80   : > { %1039 = vmatpush1.bf16.msra.mxu1 %v1038_v47  ;;  %913 = vmatprep.subr.bf16.mxu0 %v912_v48  ;;  %v313_v38 = vld [vmem:[#allocation5 + $0x370] sm:$0xff]  ;;  %v320_v40 = vld [vmem:[#allocation5 + $0x3a8] sm:$0xff]  ;;  %v318_v41 = vld [vmem:[#allocation5 + $0x398] sm:$0xff]  ;;  %v930_v43 = vpack.c.bf16 %v311_v35, %v307_v34 }
  0x81   : > { %1041 = vmatprep.subr.bf16.mxu1 %v1040_v52  ;;  %v322_v42 = vld [vmem:[#allocation5 + $0x3b8] sm:$0xff]  ;;  %v1058_v44 = vpack.c.bf16 %v313_v38, %v309_v36  ;;  %v932_v45 = vpack.c.bf16 %v320_v40, %v316_v39  ;;  %v315_v46 = vld [vmem:[#allocation5 + $0x380] sm:$0xff]  ;;  %v317_v48 = vld [vmem:[#allocation5 + $0x390] sm:$0xff] }
  0x82   : > { %v319_v47 = vld [vmem:[#allocation5 + $0x3a0] sm:$0xff]  ;;  %v1060_v49 = vpack.c.bf16 %v322_v42, %v318_v41  ;;  %v321_v50 = vld [vmem:[#allocation5 + $0x3b0] sm:$0xff]  ;;  %v324_v51 = vld [vmem:[#allocation5 + $0x3c8] sm:$0xff] }
  0x83   : > { %915 = vmatpush1.bf16.msra.mxu0 %v914_v58  ;;  %v328_v52 = vld [vmem:[#allocation5 + $0x3e8] sm:$0xff]  ;;  %v326_v53 = vld [vmem:[#allocation5 + $0x3d8] sm:$0xff]  ;;  %v934_v55 = vpack.c.bf16 %v319_v47, %v315_v46  ;;  %v1062_v56 = vpack.c.bf16 %v321_v50, %v317_v48  ;;  %v323_v58 = vld [vmem:[#allocation5 + $0x3c0] sm:$0xff] }
  0x84   : > { %1043 = vmatpush1.bf16.msra.mxu1 %v1042_v59  ;;  %917 = vmatprep.subr.bf16.mxu0 %v916_v60  ;;  %v330_v54 = vld [vmem:[#allocation5 + $0x3f8] sm:$0xff]  ;;  %v936_v57 = vpack.c.bf16 %v328_v52, %v324_v51  ;;  %v327_v59 = vld [vmem:[#allocation5 + $0x3e0] sm:$0xff]  ;;  %v325_v60 = vld [vmem:[#allocation5 + $0x3d0] sm:$0xff] }
  0x85   : > { %1045 = vmatprep.subr.bf16.mxu1 %v1044_v0  ;;  %v1064_v61 = vpack.c.bf16 %v330_v54, %v326_v53  ;;  %v329_v62 = vld [vmem:[#allocation5 + $0x3f0] sm:$0xff]  ;;  %v332_v63 = vld [vmem:[#allocation5 + $0x408] sm:$0xff]  ;;  %v334_v1 = vld [vmem:[#allocation5 + $0x418] sm:$0xff]  ;;  %v938_v3 = vpack.c.bf16 %v327_v59, %v323_v58 }
  0x86   : > { %v336_v0 = vld [vmem:[#allocation5 + $0x428] sm:$0xff]  ;;  %v338_v2 = vld [vmem:[#allocation5 + $0x438] sm:$0xff]  ;;  %v1066_v4 = vpack.c.bf16 %v329_v62, %v325_v60  ;;  %v335_v7 = vld [vmem:[#allocation5 + $0x420] sm:$0xff] }
  0x87   : > { %919 = vmatpush1.bf16.msra.mxu0 %v918_v6  ;;  %v940_v5 = vpack.c.bf16 %v336_v0, %v332_v63  ;;  %v331_v6 = vld [vmem:[#allocation5 + $0x400] sm:$0xff]  ;;  %v337_v10 = vld [vmem:[#allocation5 + $0x430] sm:$0xff]  ;;  %v340_v11 = vld [vmem:[#allocation5 + $0x448] sm:$0xff] }
  0x88   : > { %1047 = vmatpush1.bf16.msra.mxu1 %v1046_v8  ;;  %921 = vmatprep.subr.bf16.mxu0 %v920_v9  ;;  %v333_v8 = vld [vmem:[#allocation5 + $0x410] sm:$0xff]  ;;  %v1068_v9 = vpack.c.bf16 %v338_v2, %v334_v1  ;;  %v344_v12 = vld [vmem:[#allocation5 + $0x468] sm:$0xff]  ;;  %v346_v14 = vld [vmem:[#allocation5 + $0x478] sm:$0xff]  ;;  %v942_v16 = vpack.c.bf16 %v335_v7, %v331_v6 }
  0x89   : > { %1049 = vmatprep.subr.bf16.mxu1 %v1048_v13  ;;  %v342_v13 = vld [vmem:[#allocation5 + $0x458] sm:$0xff]  ;;  %v199_v15 = vld [vmem:[%s1532_s16] sm:$0xff]  ;;  %v1070_v17 = vpack.c.bf16 %v337_v10, %v333_v8  ;;  %v944_v18 = vpack.c.bf16 %v344_v12, %v340_v11  ;;  %v345_v23 = vld [vmem:[#allocation5 + $0x470] sm:$0xff] }
  0x8a   : > { %v1072_v22 = vpack.c.bf16 %v346_v14, %v342_v13  ;;  %v348_v24 = vld [vmem:[#allocation5 + $0x488] sm:$0xff]  ;;  %v350_v26 = vld [vmem:[#allocation5 + $0x498] sm:$0xff]  ;;  %v353_v35 = vld [vmem:[#allocation5 + $0x4b0] sm:$0xff] }
  0x8b   : > { %923 = vmatpush1.bf16.msra.mxu0 %v922_v19  ;;  %v339_v19 = vld [vmem:[#allocation5 + $0x440] sm:$0xff]  ;;  %v354_v27 = vld [vmem:[#allocation5 + $0x4b8] sm:$0xff]  ;;  %v356_v36 = vld [vmem:[#allocation5 + $0x4c8] sm:$0xff] }
  0x8c   : > { %1051 = vmatpush1.bf16.msra.mxu1 %v1050_v20  ;;  %925 = vmatprep.subr.bf16.mxu0 %v924_v21  ;;  %v343_v20 = vld [vmem:[#allocation5 + $0x460] sm:$0xff]  ;;  %v341_v21 = vld [vmem:[#allocation5 + $0x450] sm:$0xff]  ;;  %v1076_v34 = vpack.c.bf16 %v354_v27, %v350_v26  ;;  %v358_v38 = vld [vmem:[#allocation5 + $0x4d8] sm:$0xff] }
  0x8d   : > { %1053 = vmatprep.subr.bf16.mxu1 %v1052_v25  ;;  %v352_v25 = vld [vmem:[#allocation5 + $0x4a8] sm:$0xff]  ;;  %v946_v28 = vpack.c.bf16 %v343_v20, %v339_v19  ;;  %v1074_v29 = vpack.c.bf16 %v345_v23, %v341_v21  ;;  %v362_v39 = vld [vmem:[#allocation5 + $0x4f8] sm:$0xff]  ;;  %v361_v47 = vld [vmem:[#allocation5 + $0x4f0] sm:$0xff] }
  0x8e   : > { %v948_v30 = vpack.c.bf16 %v352_v25, %v348_v24  ;;  %v1080_v46 = vpack.c.bf16 %v362_v39, %v358_v38  ;;  %v364_v48 = vld [vmem:[#allocation5 + $0x508] sm:$0xff]  ;;  %v366_v50 = vld [vmem:[#allocation5 + $0x518] sm:$0xff]  ;;  %v369_v59 = vld [vmem:[#allocation5 + $0x530] sm:$0xff] }
  0x8f   : > { %927 = vmatpush1.bf16.msra.mxu0 %v926_v31  ;;  %v347_v31 = vld [vmem:[#allocation5 + $0x480] sm:$0xff]  ;;  %v370_v51 = vld [vmem:[#allocation5 + $0x538] sm:$0xff]  ;;  %v372_v60 = vld [vmem:[#allocation5 + $0x548] sm:$0xff] }
  0x90   : > { %1055 = vmatpush1.bf16.msra.mxu1 %v1054_v32  ;;  %929 = vmatprep.subr.bf16.mxu0 %v928_v33  ;;  %v351_v32 = vld [vmem:[#allocation5 + $0x4a0] sm:$0xff]  ;;  %v349_v33 = vld [vmem:[#allocation5 + $0x490] sm:$0xff]  ;;  %v1084_v58 = vpack.c.bf16 %v370_v51, %v366_v50  ;;  %v374_v62 = vld [vmem:[#allocation5 + $0x558] sm:$0xff] }
  0x91   : > { %1057 = vmatprep.subr.bf16.mxu1 %v1056_v37  ;;  %v360_v37 = vld [vmem:[#allocation5 + $0x4e8] sm:$0xff]  ;;  %v950_v40 = vpack.c.bf16 %v351_v32, %v347_v31  ;;  %v1078_v41 = vpack.c.bf16 %v353_v35, %v349_v33  ;;  %v378_v63 = vld [vmem:[#allocation5 + $0x578] sm:$0xff]  ;;  %v377_v7 = vld [vmem:[#allocation5 + $0x570] sm:$0xff] }
  0x92   : > { %v952_v42 = vpack.c.bf16 %v360_v37, %v356_v36  ;;  %v1088_v6 = vpack.c.bf16 %v378_v63, %v374_v62  ;;  %v380_v8 = vld [vmem:[#allocation5 + $0x588] sm:$0xff]  ;;  %v382_v10 = vld [vmem:[#allocation5 + $0x598] sm:$0xff]  ;;  %v379_v13 = vld [vmem:[#allocation5 + $0x580] sm:$0xff] }
  0x93   : > { %931 = vmatpush1.bf16.msra.mxu0 %v930_v43  ;;  %v355_v43 = vld [vmem:[#allocation5 + $0x4c0] sm:$0xff]  ;;  %v386_v11 = vld [vmem:[#allocation5 + $0x5b8] sm:$0xff]  ;;  %v388_v20 = vld [vmem:[#allocation5 + $0x5c8] sm:$0xff] }
  0x94   : > { %1059 = vmatpush1.bf16.msra.mxu1 %v1058_v44  ;;  %933 = vmatprep.subr.bf16.mxu0 %v932_v45  ;;  %v359_v44 = vld [vmem:[#allocation5 + $0x4e0] sm:$0xff]  ;;  %v357_v45 = vld [vmem:[#allocation5 + $0x4d0] sm:$0xff]  ;;  %v1092_v19 = vpack.c.bf16 %v386_v11, %v382_v10  ;;  %v392_v21 = vld [vmem:[#allocation5 + $0x5e8] sm:$0xff] }
  0x95   : > { %1061 = vmatprep.subr.bf16.mxu1 %v1060_v49  ;;  %v368_v49 = vld [vmem:[#allocation5 + $0x528] sm:$0xff]  ;;  %v954_v52 = vpack.c.bf16 %v359_v44, %v355_v43  ;;  %v1082_v53 = vpack.c.bf16 %v361_v47, %v357_v45  ;;  %v390_v23 = vld [vmem:[#allocation5 + $0x5d8] sm:$0xff]  ;;  %v968_v27 = vpack.c.bf16 %v392_v21, %v388_v20  ;;  %v393_v32 = vld [vmem:[#allocation5 + $0x5f0] sm:$0xff] }
  0x96   : > { %v956_v54 = vpack.c.bf16 %v368_v49, %v364_v48  ;;  %v394_v24 = vld [vmem:[#allocation5 + $0x5f8] sm:$0xff]  ;;  %v396_v33 = vld [vmem:[#allocation5 + $0x608] sm:$0xff]  ;;  %v401_v44 = vld [vmem:[#allocation5 + $0x630] sm:$0xff] }
  0x97   : > { %935 = vmatpush1.bf16.msra.mxu0 %v934_v55  ;;  %v363_v55 = vld [vmem:[#allocation5 + $0x500] sm:$0xff]  ;;  %v1096_v31 = vpack.c.bf16 %v394_v24, %v390_v23  ;;  %v398_v35 = vld [vmem:[#allocation5 + $0x618] sm:$0xff]  ;;  %v404_v45 = vld [vmem:[#allocation5 + $0x648] sm:$0xff] }
  0x98   : > { %1063 = vmatpush1.bf16.msra.mxu1 %v1062_v56  ;;  %937 = vmatprep.subr.bf16.mxu0 %v936_v57  ;;  %v367_v56 = vld [vmem:[#allocation5 + $0x520] sm:$0xff]  ;;  %v365_v57 = vld [vmem:[#allocation5 + $0x510] sm:$0xff]  ;;  %v402_v36 = vld [vmem:[#allocation5 + $0x638] sm:$0xff] }
  0x99   : > { %1065 = vmatprep.subr.bf16.mxu1 %v1064_v61  ;;  %v376_v61 = vld [vmem:[#allocation5 + $0x568] sm:$0xff]  ;;  %v958_v0 = vpack.c.bf16 %v367_v56, %v363_v55  ;;  %v1086_v1 = vpack.c.bf16 %v369_v59, %v365_v57  ;;  %v1100_v43 = vpack.c.bf16 %v402_v36, %v398_v35  ;;  %v406_v47 = vld [vmem:[#allocation5 + $0x658] sm:$0xff]  ;;  %v409_v56 = vld [vmem:[#allocation5 + $0x670] sm:$0xff] }
  0x9a   : > { %v960_v2 = vpack.c.bf16 %v376_v61, %v372_v60  ;;  %v410_v48 = vld [vmem:[#allocation5 + $0x678] sm:$0xff]  ;;  %v412_v57 = vld [vmem:[#allocation5 + $0x688] sm:$0xff]  ;;  %v427_v24 = vld [vmem:[#allocation5 + $0x700] sm:$0xff] }
  0x9b   : > { %939 = vmatpush1.bf16.msra.mxu0 %v938_v3  ;;  %v371_v3 = vld [vmem:[#allocation5 + $0x540] sm:$0xff]  ;;  %v1104_v55 = vpack.c.bf16 %v410_v48, %v406_v47  ;;  %v414_v59 = vld [vmem:[#allocation5 + $0x698] sm:$0xff] }
  0x9c   : > { %1067 = vmatpush1.bf16.msra.mxu1 %v1066_v4  ;;  %941 = vmatprep.subr.bf16.mxu0 %v940_v5  ;;  %v375_v4 = vld [vmem:[#allocation5 + $0x560] sm:$0xff]  ;;  %v373_v5 = vld [vmem:[#allocation5 + $0x550] sm:$0xff]  ;;  %v418_v60 = vld [vmem:[#allocation5 + $0x6b8] sm:$0xff] }
  0x9d   : > { %1069 = vmatprep.subr.bf16.mxu1 %v1068_v9  ;;  %v384_v9 = vld [vmem:[#allocation5 + $0x5a8] sm:$0xff]  ;;  %v962_v12 = vpack.c.bf16 %v375_v4, %v371_v3  ;;  %v1090_v14 = vpack.c.bf16 %v377_v7, %v373_v5  ;;  %v1108_v3 = vpack.c.bf16 %v418_v60, %v414_v59  ;;  %v417_v4 = vld [vmem:[#allocation5 + $0x6b0] sm:$0xff]  ;;  %v422_v7 = vld [vmem:[#allocation5 + $0x6d8] sm:$0xff] }
  0x9e   : > { %524 = vmatmul.mubr.f32.vlgmr.msra.gmra.mrb[0].mxu0 %v199_v15  ;;  %v420_v5 = vld [vmem:[#allocation5 + $0x6c8] sm:$0xff]  ;;  %v434_v20 = vld [vmem:[#allocation5 + $0x738] sm:$0xff]  ;;  %v435_v36 = vld [vmem:[#allocation5 + $0x740] sm:$0xff] }
  0x9f   : > { %943 = vmatpush1.bf16.msra.mxu0 %v942_v16  ;;  %666 = vmatmul.mubr.f32.vlgmr.msra.gmra.mrb[0].mxu1 %v199_v15  ;;  %v964_v15 = vpack.c.bf16 %v384_v9, %v380_v8  ;;  %v383_v16 = vld [vmem:[#allocation5 + $0x5a0] sm:$0xff]  ;;  %v426_v8 = vld [vmem:[#allocation5 + $0x6f8] sm:$0xff] }
  0xa0   : > { %1071 = vmatpush1.bf16.msra.mxu1 %v1070_v17  ;;  %945 = vmatprep.subr.bf16.mxu0 %v944_v18  ;;  %v381_v17 = vld [vmem:[#allocation5 + $0x590] sm:$0xff]  ;;  %v966_v25 = vpack.c.bf16 %v383_v16, %v379_v13  ;;  %v423_v13 = vld [vmem:[#allocation5 + $0x6e0] sm:$0xff] }
  0xa1   : > { %1073 = vmatprep.subr.bf16.mxu1 %v1072_v22  ;;  %v385_v18 = vld [vmem:[#allocation5 + $0x5b0] sm:$0xff]  ;;  %v202_v22 = vld [vmem:[%s1532_s16 + $0x18] sm:$0xff]  ;;  %v443_v48 = vld [vmem:[#allocation5 + $0x780] sm:$0xff] }
  0xa2   : > { %594 = vmatprep.mubr.f32.mxu0 %v202_v22  ;;  %736 = vmatprep.mubr.f32.mxu1 %v202_v22  ;;  %v1094_v26 = vpack.c.bf16 %v385_v18, %v381_v17  ;;  %v425_v16 = vld [vmem:[#allocation5 + $0x6f0] sm:$0xff]  ;;  %v428_v17 = vld [vmem:[#allocation5 + $0x708] sm:$0xff]  ;;  %v451_v60 = vld [vmem:[#allocation5 + $0x7c0] sm:$0xff] }
  0xa3   : > { %947 = vmatpush1.bf16.msra.mxu0 %v946_v28  ;;  %v387_v28 = vld [vmem:[#allocation5 + $0x5c0] sm:$0xff]  ;;  %v432_v18 = vld [vmem:[#allocation5 + $0x728] sm:$0xff] }
  0xa4   : > { %1075 = vmatpush1.bf16.msra.mxu1 %v1074_v29  ;;  %949 = vmatprep.subr.bf16.mxu0 %v948_v30  ;;  %v391_v29 = vld [vmem:[#allocation5 + $0x5e0] sm:$0xff]  ;;  %v389_v30 = vld [vmem:[#allocation5 + $0x5d0] sm:$0xff]  ;;  %v988_v23 = vpack.c.bf16 %v432_v18, %v428_v17 }
  0xa5   : > { %1077 = vmatprep.subr.bf16.mxu1 %v1076_v34  ;;  %v400_v34 = vld [vmem:[#allocation5 + $0x628] sm:$0xff]  ;;  %v970_v37 = vpack.c.bf16 %v391_v29, %v387_v28  ;;  %v1098_v38 = vpack.c.bf16 %v393_v32, %v389_v30  ;;  %v433_v28 = vld [vmem:[#allocation5 + $0x730] sm:$0xff]  ;;  %v442_v32 = vld [vmem:[#allocation5 + $0x778] sm:$0xff] }
  0xa6   : > { %v972_v39 = vpack.c.bf16 %v400_v34, %v396_v33  ;;  %v436_v29 = vld [vmem:[#allocation5 + $0x748] sm:$0xff] }
  0xa7   : > { %951 = vmatpush1.bf16.msra.mxu0 %v950_v40  ;;  %v395_v40 = vld [vmem:[#allocation5 + $0x600] sm:$0xff]  ;;  %v440_v30 = vld [vmem:[#allocation5 + $0x768] sm:$0xff] }
  0xa8   : > { %1079 = vmatpush1.bf16.msra.mxu1 %v1078_v41  ;;  %953 = vmatprep.subr.bf16.mxu0 %v952_v42  ;;  %v399_v41 = vld [vmem:[#allocation5 + $0x620] sm:$0xff]  ;;  %v397_v42 = vld [vmem:[#allocation5 + $0x610] sm:$0xff]  ;;  %v992_v35 = vpack.c.bf16 %v440_v30, %v436_v29 }
  0xa9   : > { %1081 = vmatprep.subr.bf16.mxu1 %v1080_v46  ;;  %v408_v46 = vld [vmem:[#allocation5 + $0x668] sm:$0xff]  ;;  %v974_v49 = vpack.c.bf16 %v399_v41, %v395_v40  ;;  %v1102_v50 = vpack.c.bf16 %v401_v44, %v397_v42  ;;  %v441_v40 = vld [vmem:[#allocation5 + $0x770] sm:$0xff]  ;;  %v450_v44 = vld [vmem:[#allocation5 + $0x7b8] sm:$0xff] }
  0xaa   : > { %v976_v51 = vpack.c.bf16 %v408_v46, %v404_v45  ;;  %v444_v41 = vld [vmem:[#allocation5 + $0x788] sm:$0xff] }
  0xab   : > { %955 = vmatpush1.bf16.msra.mxu0 %v954_v52  ;;  %v403_v52 = vld [vmem:[#allocation5 + $0x640] sm:$0xff]  ;;  %v448_v42 = vld [vmem:[#allocation5 + $0x7a8] sm:$0xff] }
  0xac   : > { %1083 = vmatpush1.bf16.msra.mxu1 %v1082_v53  ;;  %957 = vmatprep.subr.bf16.mxu0 %v956_v54  ;;  %v407_v53 = vld [vmem:[#allocation5 + $0x660] sm:$0xff]  ;;  %v405_v54 = vld [vmem:[#allocation5 + $0x650] sm:$0xff]  ;;  %v996_v47 = vpack.c.bf16 %v448_v42, %v444_v41 }
  0xad   : > { %1085 = vmatprep.subr.bf16.mxu1 %v1084_v58  ;;  %v416_v58 = vld [vmem:[#allocation5 + $0x6a8] sm:$0xff]  ;;  %v978_v61 = vpack.c.bf16 %v407_v53, %v403_v52  ;;  %v1106_v62 = vpack.c.bf16 %v409_v56, %v405_v54  ;;  %v449_v52 = vld [vmem:[#allocation5 + $0x7b0] sm:$0xff]  ;;  %v458_v56 = vld [vmem:[#allocation5 + $0x7f8] sm:$0xff] }
  0xae   : > { %v980_v63 = vpack.c.bf16 %v416_v58, %v412_v57  ;;  %v452_v53 = vld [vmem:[#allocation5 + $0x7c8] sm:$0xff] }
  0xaf   : > { %959 = vmatpush1.bf16.msra.mxu0 %v958_v0  ;;  %v411_v0 = vld [vmem:[#allocation5 + $0x680] sm:$0xff]  ;;  %v456_v54 = vld [vmem:[#allocation5 + $0x7e8] sm:$0xff] }
  0xb0   : > { %1087 = vmatpush1.bf16.msra.mxu1 %v1086_v1  ;;  %961 = vmatprep.subr.bf16.mxu0 %v960_v2  ;;  %v415_v1 = vld [vmem:[#allocation5 + $0x6a0] sm:$0xff]  ;;  %v413_v2 = vld [vmem:[#allocation5 + $0x690] sm:$0xff]  ;;  %v1000_v59 = vpack.c.bf16 %v456_v54, %v452_v53 }
  0xb1   : > { %1089 = vmatprep.subr.bf16.mxu1 %v1088_v6  ;;  %v424_v6 = vld [vmem:[#allocation5 + $0x6e8] sm:$0xff]  ;;  %v982_v9 = vpack.c.bf16 %v415_v1, %v411_v0  ;;  %v1110_v10 = vpack.c.bf16 %v417_v4, %v413_v2  ;;  %v457_v0 = vld [vmem:[#allocation5 + $0x7f0] sm:$0xff] }
  0xb2   : > { %v984_v11 = vpack.c.bf16 %v424_v6, %v420_v5 }
  0xb3   : > { %963 = vmatpush1.bf16.msra.mxu0 %v962_v12  ;;  %v419_v12 = vld [vmem:[#allocation5 + $0x6c0] sm:$0xff] }
  0xb4   : > { %1091 = vmatpush1.bf16.msra.mxu1 %v1090_v14  ;;  %965 = vmatprep.subr.bf16.mxu0 %v964_v15  ;;  %v421_v14 = vld [vmem:[#allocation5 + $0x6d0] sm:$0xff]  ;;  %v1112_v15 = vpack.c.bf16 %v426_v8, %v422_v7  ;;  %v986_v21 = vpack.c.bf16 %v423_v13, %v419_v12 }
  0xb5   : > { %1093 = vmatprep.subr.bf16.mxu1 %v1092_v19  ;;  %v430_v19 = vld [vmem:[#allocation5 + $0x718] sm:$0xff]  ;;  %v1114_v22 = vpack.c.bf16 %v425_v16, %v421_v14 }
  0xb7   : > { %967 = vmatpush1.bf16.msra.mxu0 %v966_v25  ;;  %v431_v25 = vld [vmem:[#allocation5 + $0x720] sm:$0xff] }
  0xb8   : > { %1095 = vmatpush1.bf16.msra.mxu1 %v1094_v26  ;;  %969 = vmatprep.subr.bf16.mxu0 %v968_v27  ;;  %v429_v26 = vld [vmem:[#allocation5 + $0x710] sm:$0xff]  ;;  %v1116_v27 = vpack.c.bf16 %v434_v20, %v430_v19  ;;  %v990_v33 = vpack.c.bf16 %v431_v25, %v427_v24 }
  0xb9   : > { %1097 = vmatprep.subr.bf16.mxu1 %v1096_v31  ;;  %v438_v31 = vld [vmem:[#allocation5 + $0x758] sm:$0xff]  ;;  %v1118_v34 = vpack.c.bf16 %v433_v28, %v429_v26 }
  0xbb   : > { %971 = vmatpush1.bf16.msra.mxu0 %v970_v37  ;;  %v439_v37 = vld [vmem:[#allocation5 + $0x760] sm:$0xff] }
  0xbc   : > { %1099 = vmatpush1.bf16.msra.mxu1 %v1098_v38  ;;  %973 = vmatprep.subr.bf16.mxu0 %v972_v39  ;;  %v437_v38 = vld [vmem:[#allocation5 + $0x750] sm:$0xff]  ;;  %v1120_v39 = vpack.c.bf16 %v442_v32, %v438_v31  ;;  %v994_v45 = vpack.c.bf16 %v439_v37, %v435_v36 }
  0xbd   : > { %1101 = vmatprep.subr.bf16.mxu1 %v1100_v43  ;;  %v446_v43 = vld [vmem:[#allocation5 + $0x798] sm:$0xff]  ;;  %v1122_v46 = vpack.c.bf16 %v441_v40, %v437_v38 }
  0xbf   : > { %975 = vmatpush1.bf16.msra.mxu0 %v974_v49  ;;  %v447_v49 = vld [vmem:[#allocation5 + $0x7a0] sm:$0xff] }
  0xc0   : > { %1103 = vmatpush1.bf16.msra.mxu1 %v1102_v50  ;;  %977 = vmatprep.subr.bf16.mxu0 %v976_v51  ;;  %v445_v50 = vld [vmem:[#allocation5 + $0x790] sm:$0xff]  ;;  %v1124_v51 = vpack.c.bf16 %v450_v44, %v446_v43  ;;  %v998_v57 = vpack.c.bf16 %v447_v49, %v443_v48 }
  0xc1   : > { %1105 = vmatprep.subr.bf16.mxu1 %v1104_v55  ;;  %v454_v55 = vld [vmem:[#allocation5 + $0x7d8] sm:$0xff]  ;;  %v1126_v58 = vpack.c.bf16 %v449_v52, %v445_v50 }
  0xc3   : > { %979 = vmatpush1.bf16.msra.mxu0 %v978_v61  ;;  %v455_v61 = vld [vmem:[#allocation5 + $0x7e0] sm:$0xff] }
  0xc4   : > { %1107 = vmatpush1.bf16.msra.mxu1 %v1106_v62  ;;  %981 = vmatprep.subr.bf16.mxu0 %v980_v63  ;;  %v1128_v62 = vpack.c.bf16 %v458_v56, %v454_v55  ;;  %v453_v63 = vld [vmem:[#allocation5 + $0x7d0] sm:$0xff]  ;;  %v1002_v1 = vpack.c.bf16 %v455_v61, %v451_v60 }
  0xc5   : > { %1109 = vmatprep.subr.bf16.mxu1 %v1108_v3  ;;  %v1130_v2 = vpack.c.bf16 %v457_v0, %v453_v63  ;;  %v201_v3 = vld [vmem:[%s1532_s16 + $0x10] sm:$0xff] }
  0xc7   : > { %983 = vmatpush1.bf16.msra.mxu0 %v982_v9 }
  0xc8   : > { %1111 = vmatpush1.bf16.msra.mxu1 %v1110_v10  ;;  %985 = vmatprep.subr.bf16.mxu0 %v984_v11 }
  0xc9   : > { %1113 = vmatprep.subr.bf16.mxu1 %v1112_v15 }
  0xcb   : > { %987 = vmatpush1.bf16.msra.mxu0 %v986_v21 }
  0xcc   : > { %1115 = vmatpush1.bf16.msra.mxu1 %v1114_v22  ;;  %989 = vmatprep.subr.bf16.mxu0 %v988_v23 }
  0xcd   : > { %1117 = vmatprep.subr.bf16.mxu1 %v1116_v27 }
  0xcf   : > { %991 = vmatpush1.bf16.msra.mxu0 %v990_v33 }
  0xd0   : > { %1119 = vmatpush1.bf16.msra.mxu1 %v1118_v34  ;;  %993 = vmatprep.subr.bf16.mxu0 %v992_v35 }
  0xd1   : > { %1121 = vmatprep.subr.bf16.mxu1 %v1120_v39 }
  0xd3   : > { %995 = vmatpush1.bf16.msra.mxu0 %v994_v45 }
  0xd4   : > { %1123 = vmatpush1.bf16.msra.mxu1 %v1122_v46  ;;  %997 = vmatprep.subr.bf16.mxu0 %v996_v47 }
  0xd5   : > { %1125 = vmatprep.subr.bf16.mxu1 %v1124_v51 }
  0xd7   : > { %999 = vmatpush1.bf16.msra.mxu0 %v998_v57 }
  0xd8   : > { %1127 = vmatpush1.bf16.msra.mxu1 %v1126_v58  ;;  %1001 = vmatprep.subr.bf16.mxu0 %v1000_v59 }
  0xd9   : > { %1129 = vmatprep.subr.bf16.mxu1 %v1128_v62 }
  0xdb   : > { %1003 = vmatpush1.bf16.msra.mxu0 %v1002_v1 }
  0xdc   : > { %1131 = vmatpush1.bf16.msra.mxu1 %v1130_v2 }
  0xde   : > { %595 = vmatmul.mubr.f32.vlgmr.msra.gmra.mrb[0].mxu0 %v201_v3 }
  0xdf   : > { %737 = vmatmul.mubr.f32.vlgmr.msra.gmra.mrb[0].mxu1 %v201_v3 }
 0x1b1   : > { %v596_v4 = vpop.f32.mrb[0].mxu0 }
 0x1b2   : > { %743 = vst [vmem:[%s196_s17] sm:$0xff] %v596_v4  ;;  %v738_v5 = vpop.f32.mrb[0].mxu1  ;;  %v598_v6 = vpop.f32.mrb[1].mxu0 }
 0x1b3   : > { %745 = vst [vmem:[%s196_s17 + $0x10] sm:$0xff] %v738_v5  ;;  %744 = vst [vmem:[%s196_s17 + $0x8] sm:$0xff] %v598_v6  ;;  %v740_v7 = vpop.f32.mrb[1].mxu1 }
 0x1b4   : > { %746 = vst [vmem:[%s196_s17 + $0x18] sm:$0xff] %v740_v7 }
 0x1b5   : > { %1282 = shalt.err (!%p1279_p5)
}
 0x1b6   : > { %s1283_s23 = scalar_lea.hbm %s1554_s6, 512  ;;  %s1287_s3 = scalar_lea.hbm %s1603_s2, 1024 }
 0x1b7   : > { %p1284_p9 = scmp.ne.s32.totalorder %s1554_s6, %s1283_s23  ;;  %p1288_p7 = scmp.lt.u32.totalorder %s1554_s6, %s1603_s2 }
 0x1b8   : > { %p1289_p3 = scmp.lt.u32.totalorder %s1287_s3, %s1283_s23  ;;  %p1291_p4 = scmp.lt.u32.totalorder %s1283_s23, %s1554_s6 }
 0x1b9   : > { %p1285_p1 = pnand %p1284_p9, %p1473_p10 }
 0x1ba   : > { %p1290_p13 = por %p1289_p3, %p1288_p7 }
 0x1bb   : > { %p1286_p2 = pneg %p1285_p1 }
 0x1bc   : > { %p1292_p6 = por %p1291_p4, %p1290_p13 }
 0x1be   : > { %p1293_p8 = pnand %p1292_p6, %p1286_p2 }
 0x1c0   : > { %1296 = shalt.err (!%p1293_p8)
}
 0x1c1   : > { %1142 = dma.vmem_to_hbm [thread:$0]  (%p1473_p10), %s1549_s19, 512, %s1554_s6, %s748_s7  }
 0x1c2 PF: > { %s776_s15 = sand.u32 1, %s1335_s9   ;;  %p1621_p12 = scmp.ne.s32.totalorder %s1611_s20, 0 }
 0x1c3   : > { %p1622_p11 = scmp.ge.s32.totalorder %s1355_s14, 2  ;;  %s777_s16 = scalar_lea.sflag [#allocation4], %s776_s15 }
 0x1c5   : > { %p1153_p0 = pnand %p1622_p11, %p1621_p12 }
 0x1c7   : > { %1330 = dma.done.wait (!%p1153_p0), %s777_s16, 512  }
 0x1c8   : > { %1332 = vsyncadd (!%p1153_p0), %s777_s16, 4294966784  ;;  %s19_s14 = sadd.s32 1, %s1355_s14   ;;  %s1623_s9 = smov %s1339_s10 }
 0x1c9   : > { %p16_p5 = scmp.ge.s32.totalorder %s19_s14, 4   ;;  %s1624_s10 = smov %s1343_s11 }
 0x1ca   : > { %s1625_s11 = smov %s1482_s28  ;;  %s1626_s12 = smov %s1351_s13 }
 0x1cb   : > { %s1627_s13 = smov %s1629_s25  ;;  %18 = sbr.rel (!%p16_p5) target bundleno = 7 (0x7), region = 78 }
 0x1d2   :  { %782 = vsyncpa [#allocation3], 1 }
 0x1d3   :  { %784 = vsyncpa [#allocation3 + $0x1], 1 }
 0x1d4   :  { %785 = vsyncpa [#allocation6], 1 }
 0x1d5   :  { %786 = vsyncpa [#allocation4], 1 }
 0x1d6   :  { %788 = vsyncpa [#allocation4 + $0x1], 1 }

</bundles_post_ra>
